<compile_context>
chip_gen: v7x
topology: tpu7x:2x2x1
jax: 0.10.0
libtpu: 0.0.40
codegen_flags: <defaults>
</compile_context>

<pallas_src>
import jax
import jax.numpy as jnp
from jax.experimental import pallas as pl
from jax.experimental.pallas import tpu as pltpu


def _reg_weighted_l1_kernel(ind_ref,    # (Bt, K, 1) int32
                            feat_ref,   # (Bt, C, HW) feature slab
                            mask_ref,   # (Bt, K, C)
                            tgt_ref,    # (Bt, K, C)
                            out_ref):   # (1, 2) fused partials: [abs_sum, mask_sum]
    ind = ind_ref[...]                                    # (Bt, K, 1)
    feat = feat_ref[...]                                  # (Bt, C, HW)
    m = mask_ref[...].astype(jnp.float32)                 # (Bt, K, C)
    t = tgt_ref[...].astype(jnp.float32)

    bt, kk, _ = ind.shape
    hw = feat.shape[-1]

    # Exact on-chip gather via 0/1 one-hot matmul on the MXU (idle otherwise):
    # pred[b, k, c] == feat[b, c, ind[b, k]] exactly (single nonzero term, f32 acc).
    iota = jax.lax.broadcasted_iota(jnp.int32, (bt, kk, hw), 2)
    onehot = (iota == ind).astype(feat.dtype)             # exactly 0.0 / 1.0
    pred = jnp.einsum('bkh,bch->bkc', onehot, feat,
                      preferred_element_type=jnp.float32)

    # Matches F.l1_loss(pred*mask, target*mask, reduction='sum') term-by-term.
    diff = jnp.abs(pred * m - t * m)
    abs_sum = jnp.sum(diff)
    msk_sum = jnp.sum(m)

    lane = jax.lax.broadcasted_iota(jnp.int32, (1, 2), 1)
    out_ref[...] = jnp.where(lane == 0, abs_sum, msk_sum)


def _pick_batch_tile(B, bytes_per_batch, budget_bytes=6 << 20):
    """Largest divisor of B whose double-buffered blocks fit the VMEM budget,
    keeping >= 2 grid steps when B >= 2 (v7x megacore split)."""
    cap = max(1, budget_bytes // max(1, 2 * bytes_per_batch))
    cap = min(cap, B)
    if B >= 2:
        cap = max(1, min(cap, B // 2))
    for bt in range(cap, 0, -1):
        if B % bt == 0:
            return bt
    return 1


@jax.jit
def reg_weighted_l1_loss(output, mask, ind, target):
    """output: (B, C, H, W); mask/target: (B, K, C); ind: (B, K) ints into H*W."""
    B, C, H, W = output.shape
    K = ind.shape[1]
    HW = H * W

    feat = output.reshape(B, C, HW)                          # free reshape of NCHW
    ind3 = jnp.clip(ind.astype(jnp.int32), 0, HW - 1).reshape(B, K, 1)
    mask_f = mask.astype(jnp.float32)
    target_f = target.astype(jnp.float32)

    itemsize = jnp.dtype(output.dtype).itemsize
    bytes_per_batch = C * HW * itemsize + 2 * K * C * 4 + K * 4
    Bt = _pick_batch_tile(B, bytes_per_batch)
    n_steps = B // Bt

    # Memory-bound stream + small matmul; tell XLA so it schedules around it well.
    cost = pl.CostEstimate(
        flops=2 * B * K * HW * C + 5 * B * K * C,
        transcendentals=0,
        bytes_accessed=(B * C * HW * itemsize        # feature slabs
                        + 2 * B * K * C * 4          # mask + target
                        + B * K * 4                  # ind
                        + n_steps * 2 * 4))          # fused partial outputs

    partials = pl.pallas_call(
        _reg_weighted_l1_kernel,
        out_shape=jax.ShapeDtypeStruct((n_steps, 1, 2), jnp.float32),
        grid=(n_steps,),
        in_specs=[
            pl.BlockSpec((Bt, K, 1), lambda i: (i, 0, 0)),     # ind
            pl.BlockSpec((Bt, C, HW), lambda i: (i, 0, 0)),    # streamed feature slab
            pl.BlockSpec((Bt, K, C), lambda i: (i, 0, 0)),     # mask (no transpose)
            pl.BlockSpec((Bt, K, C), lambda i: (i, 0, 0)),     # target (no transpose)
        ],
        out_specs=pl.BlockSpec((None, 1, 2), lambda i: (i, 0, 0)),
        compiler_params=pltpu.CompilerParams(
            dimension_semantics=("parallel",)),                # independent batch steps
        cost_estimate=cost,
    )(ind3, feat, mask_f, target_f)

    # Tiny final reduce + normalize over the grid-step partials in XLA.
    return jnp.sum(partials[:, 0, 0]) / (jnp.sum(partials[:, 0, 1]) + 1e-4)


def _reference_loss(output, mask, ind, target):
    B, C, H, W = output.shape
    feat = jnp.transpose(output, (0, 2, 3, 1)).reshape(B, H * W, C)
    pred = jnp.take_along_axis(feat, ind[:, :, None].astype(jnp.int32), axis=1)
    num = jnp.sum(jnp.abs(pred * mask - target * mask))
    return num / (jnp.sum(mask) + 1e-4)


if __name__ == "__main__":
    B, C, H, W, K = 2, 4, 16, 16, 8

    key = jax.random.PRNGKey(0)
    k1, k2, k3, k4 = jax.random.split(key, 4)

    output = jax.random.normal(k1, (B, C, H, W), dtype=jnp.float32)
    target = jax.random.normal(k2, (B, K, C), dtype=jnp.float32)
    ind = jax.random.randint(k3, (B, K), 0, H * W, dtype=jnp.int32)
    # binary validity mask, expanded to channels (as CenterNet does for reg losses)
    mask = (jax.random.uniform(k4, (B, K, 1)) > 0.3).astype(jnp.float32)
    mask = jnp.broadcast_to(mask, (B, K, C))

    loss = jax.block_until_ready(reg_weighted_l1_loss(output, mask, ind, target))
    ref = _reference_loss(output, mask, ind, target)
    assert jnp.allclose(loss, ref, rtol=1e-5, atol=1e-5), (loss, ref)

    print("KERNEL_OK")
</pallas_src>

<mosaic_0001>
module attributes {stable_mosaic.version = 11 : i64} {
  func.func @_reg_weighted_l1_kernel(%arg0: i32, %arg1: memref<1x8x1xi32, #tpu.memory_space<vmem>>, %arg2: memref<1x4x256xf32, #tpu.memory_space<vmem>>, %arg3: memref<1x8x4xf32, #tpu.memory_space<vmem>>, %arg4: memref<1x8x4xf32, #tpu.memory_space<vmem>>, %arg5: memref<1x1x2xf32, #tpu.memory_space<vmem>>) attributes {dimension_semantics = [#tpu.dimension_semantics<parallel>], iteration_bounds = array<i64: 2>, scalar_prefetch = 0 : i64, scratch_operands = 0 : i64, tpu.core_type = #tpu.core_type<tc>, window_params = [{transform_indices = @transform_0, window_bounds = array<i64: 1, 8, 1>}, {transform_indices = @transform_1, window_bounds = array<i64: 1, 4, 256>}, {transform_indices = @transform_2, window_bounds = array<i64: 1, 8, 4>}, {transform_indices = @transform_3, window_bounds = array<i64: 1, 8, 4>}, {transform_indices = @transform_4, window_bounds = array<i64: 1, 1, 2>}]} {
    %c0 = arith.constant 0 : index
    %c0_0 = arith.constant 0 : index
    %c0_1 = arith.constant 0 : index
    %0 = vector.load %arg1[%c0, %c0_0, %c0_1] : memref<1x8x1xi32, #tpu.memory_space<vmem>>, vector<1x8x1xi32>
    %c0_2 = arith.constant 0 : index
    %c0_3 = arith.constant 0 : index
    %c0_4 = arith.constant 0 : index
    %1 = vector.load %arg2[%c0_2, %c0_3, %c0_4] : memref<1x4x256xf32, #tpu.memory_space<vmem>>, vector<1x4x256xf32>
    %c0_5 = arith.constant 0 : index
    %c0_6 = arith.constant 0 : index
    %c0_7 = arith.constant 0 : index
    %2 = vector.load %arg3[%c0_5, %c0_6, %c0_7] : memref<1x8x4xf32, #tpu.memory_space<vmem>>, vector<1x8x4xf32>
    %c0_8 = arith.constant 0 : index
    %c0_9 = arith.constant 0 : index
    %c0_10 = arith.constant 0 : index
    %3 = vector.load %arg4[%c0_8, %c0_9, %c0_10] : memref<1x8x4xf32, #tpu.memory_space<vmem>>, vector<1x8x4xf32>
    %4 = tpu.iota {dimensions = array<i32: 2>} : vector<1x8x256xi32>
    %5 = vector.broadcast %0 : vector<1x8x1xi32> to vector<1x8x256xi32>
    %6 = arith.cmpi eq, %4, %5 : vector<1x8x256xi32>
    %7 = arith.extui %6 : vector<1x8x256xi1> to vector<1x8x256xi32>
    %8 = arith.sitofp %7 : vector<1x8x256xi32> to vector<1x8x256xf32>
    "tpu.trace_start"() <{level = 10 : i32, message = "bkh,bch->bkc"}> : () -> ()
    %cst = arith.constant dense<0.000000e+00> : vector<1x8x4xf32>
    %9 = tpu.matmul %8, %1, %cst {dimension_numbers = #tpu.dot_dimension_numbers<[2], [2], [1], [1], [0, 0, 0, 1, 1, 1], [0], [0]>} : vector<1x8x256xf32>, vector<1x4x256xf32>, vector<1x8x4xf32> -> vector<1x8x4xf32>
    "tpu.trace_stop"() : () -> ()
    %10 = arith.mulf %9, %2 : vector<1x8x4xf32>
    %11 = arith.mulf %3, %2 : vector<1x8x4xf32>
    %12 = arith.subf %10, %11 : vector<1x8x4xf32>
    %13 = math.absf %12 : vector<1x8x4xf32>
    %14 = vector.shape_cast %13 : vector<1x8x4xf32> to vector<1x1x8x4xf32>
    %cst_11 = arith.constant dense<0.000000e+00> : vector<1xf32>
    %15 = vector.multi_reduction <add>, %14, %cst_11 [1, 2, 3] : vector<1x1x8x4xf32> to vector<1xf32>
    %16 = vector.shape_cast %15 : vector<1xf32> to vector<1x1x1x1xf32>
    %17 = vector.extract %16[0, 0, 0, 0] : f32 from vector<1x1x1x1xf32>
    %18 = vector.shape_cast %2 : vector<1x8x4xf32> to vector<1x1x8x4xf32>
    %cst_12 = arith.constant dense<0.000000e+00> : vector<1xf32>
    %19 = vector.multi_reduction <add>, %18, %cst_12 [1, 2, 3] : vector<1x1x8x4xf32> to vector<1xf32>
    %20 = vector.shape_cast %19 : vector<1xf32> to vector<1x1x1x1xf32>
    %21 = vector.extract %20[0, 0, 0, 0] : f32 from vector<1x1x1x1xf32>
    %22 = tpu.iota {dimensions = array<i32: 1>} : vector<1x2xi32>
    %c0_i32 = arith.constant 0 : i32
    %23 = vector.broadcast %c0_i32 : i32 to vector<1x2xi32>
    %24 = arith.cmpi eq, %22, %23 : vector<1x2xi32>
    %25 = vector.broadcast %17 : f32 to vector<1x2xf32>
    %26 = vector.broadcast %21 : f32 to vector<1x2xf32>
    %27 = arith.select %24, %25, %26 : vector<1x2xi1>, vector<1x2xf32>
    %c0_13 = arith.constant 0 : index
    %c0_14 = arith.constant 0 : index
    %c0_15 = arith.constant 0 : index
    %28 = vector.load %arg5[%c0_13, %c0_14, %c0_15] : memref<1x1x2xf32, #tpu.memory_space<vmem>>, vector<1x1x2xf32>
    %29 = vector.shape_cast %28 : vector<1x1x2xf32> to vector<1x2xf32>
    %30 = vector.shape_cast %27 : vector<1x2xf32> to vector<1x1x2xf32>
    tpu.vector_store %arg5[%c0_13, %c0_14, %c0_15], %30 {strides = array<i32>} : memref<1x1x2xf32, #tpu.memory_space<vmem>>, vector<1x1x2xf32>,
    return
  }
  func.func @transform_0(%arg0: i32) -> (i32, i32, i32) {
    %c0_i32 = arith.constant 0 : i32
    %c0_i32_0 = arith.constant 0 : i32
    %c0_i32_1 = arith.constant 0 : i32
    return %arg0, %c0_i32, %c0_i32_0 : i32, i32, i32
  }
  func.func @transform_1(%arg0: i32) -> (i32, i32, i32) {
    %c0_i32 = arith.constant 0 : i32
    %c0_i32_0 = arith.constant 0 : i32
    %c0_i32_1 = arith.constant 0 : i32
    return %arg0, %c0_i32, %c0_i32_0 : i32, i32, i32
  }
  func.func @transform_2(%arg0: i32) -> (i32, i32, i32) {
    %c0_i32 = arith.constant 0 : i32
    %c0_i32_0 = arith.constant 0 : i32
    %c0_i32_1 = arith.constant 0 : i32
    return %arg0, %c0_i32, %c0_i32_0 : i32, i32, i32
  }
  func.func @transform_3(%arg0: i32) -> (i32, i32, i32) {
    %c0_i32 = arith.constant 0 : i32
    %c0_i32_0 = arith.constant 0 : i32
    %c0_i32_1 = arith.constant 0 : i32
    return %arg0, %c0_i32, %c0_i32_0 : i32, i32, i32
  }
  func.func @transform_4(%arg0: i32) -> (i32, i32, i32) {
    %c0_i32 = arith.constant 0 : i32
    %c0_i32_0 = arith.constant 0 : i32
    %c0_i32_1 = arith.constant 0 : i32
    return %arg0, %c0_i32, %c0_i32_0 : i32, i32, i32
  }
}

</mosaic_0001>

<bundles_post_ra>
// kernel: reg_weighted_l1_loss.1
= control target key start
LH: loop header
LB: loop body
LE: loop exit
PB: predicated region body
PF: predicated region fallthrough
CT: control target
= control target key end

     0   :  { %s516_s15 = smov 0   ;;  %s546_s0 = inlined_call_operand.vmem [shape: s32[2,8,1], index: 0, kind: input, shape index: {}]   ;;  %s547_s1 = inlined_call_operand.vmem [shape: f32[2,4,256], index: 1, kind: input, shape index: {}]   ;;  %s548_s2 = inlined_call_operand.vmem [shape: f32[2,8,4], index: 2, kind: input, shape index: {}]   ;;  %s549_s3 = inlined_call_operand.vmem [shape: f32[2,8,4], index: 3, kind: input, shape index: {}]   ;;  %s550_s4 = inlined_call_operand.vmem [shape: f32[2,1,2], index: 4, kind: output, shape index: {}]  }
   0x1 LB: > { %s448_s16 = sadd.s32 4294967295, %s487_s15   ;;  %p452_p0 = scmp.ge.s32.totalorder %s487_s15, 1  ;;  %s487_s15 = sphi %s516_s15, %s14_s15  }
   0x2   : > { %p189_p1 = scmp.lt.s32.totalorder %s487_s15, 3 }
   0x4   : > { %p190_p2 = pnand %p452_p0, %p189_p1 }
   0x5   : > { %p225_p3 = scmp.lt.s32.totalorder (!%p190_p2), %s448_s16, 1  ;;  %v489_v0 = vmov (!%p190_p2), 0   ;;  %v249_v4 = vlaneseq (!%p190_p2)  ;;  %v490_v8 = vmov (!%p190_p2), 1.0   ;;  %vm338_vm2 = vcmask (!%p190_p2), 31744  }
   0x6   : > { %193 = sbr.rel (%p190_p2) target bundleno = 574 (0x23e), region = 36  ;;  %479 = vset.pattern.permute.xlu0 (!%p190_p2), %v489_v0  ;;  %vm363_vm4 = vcmask (!%p190_p2), 8192  }
   0x7   : > { %v250_v5 = vand.u32 (!%p190_p2), 127, %v249_v4 }
   0x9   : > { %v251_v6 = vadd.s32 (!%p190_p2), 128, %v250_v5  ;;  %vm359_vm3 = vcmp.eq.s32.totalorder (!%p190_p2), %v250_v5, 0 }
   0xd   : > { %s552_s16 = smov (!%p225_p3, %s448_s16), 1 }
   0xe   : > { %s453_s17 = sshll.u32 %s552_s16, 3  ;;  %s244_s7 = scalar_lea.vmem %s550_s4, %s552_s16 }
   0xf   : > { %s228_s20 = scalar_lea.vmem %s546_s0, %s453_s17  ;;  %s233_s23 = scalar_lea.vmem %s547_s1, %s453_s17 }
  0x10   : > { %v245_v1 = vld [vmem:[%s228_s20] sm:$0xff]  ;;  %s237_s26 = scalar_lea.vmem %s548_s2, %s453_s17  ;;  %s241_s29 = scalar_lea.vmem %s549_s3, %s453_s17 }
  0x11   : > { %v246_v2 = vld [vmem:[%s233_s23] sm:$0xff]  ;;  %253 = vperm.xlu0 %479, %v245_v1  }
  0x12   : > { %v262_v3 = vcombine.high %v246_v2, %v246_v2  ;;  %v247_v9 = vld [vmem:[%s237_s26] sm:$0xff] }
  0x13   : > { %v349_v10 = vsel %vm338_vm2, %v247_v9, 0.0  ;;  %v248_v11 = vld [vmem:[%s241_s29] sm:$0xff] }
  0x14   : > { %264 = vmatprep.subr.mxu0 %v262_v3  ;;  %350 = vadd.xlane.f32.xlu1 %v349_v10  ;;  %v335_v12 = vmul.f32 %v248_v11, %v247_v9 }
  0x15   : > { %265 = vmatpush1.xpose.msra.mxu0 %v246_v2 }
  0x90   : > { %v254_v7 = vpop.permute.xlu0 %253 }
  0x91   : > { %vm255_vm0 = vcmp.eq.s32.totalorder %v250_v5, %v254_v7  ;;  %vm256_vm1 = vcmp.eq.s32.totalorder %v251_v6, %v254_v7 }
  0x92   : > { %460 = vmatprep.mubr.msk.f32.mxu0 %vm256_vm1, %v490_v8 }
  0x93   : > { %461 = vmatmul.mubr.msk.f32.vlgmr.msra.gmra.mrb[0].mxu0 %vm255_vm0, %v490_v8 }
  0xa1   : > { %v351_v19 = vpop.xlane.xlu1 %350 }
  0xa2   : > { %v352_v20 = vrot.slane %v351_v19, 4 }
  0xa4   : > { %v353_v21 = vadd.f32 %v352_v20, %v351_v19 }
  0xa6   : > { %v354_v22 = vrot.slane %v353_v21, 2 }
  0xa8   : > { %v355_v26 = vadd.f32 %v354_v22, %v353_v21 }
  0xaa   : > { %v356_v29 = vrot.slane %v355_v26, 1 }
  0xac   : > { %v357_v32 = vadd.f32 %v356_v29, %v355_v26 }
 0x166   : > { %v330_v13 = vpop.f32.mrb[0].mxu0 }
 0x167   : > { %v334_v14 = vmul.f32 %v330_v13, %v247_v9  ;;  %v332_v15 = vpop.f32.mrb[1].mxu0 }
 0x169   : > { %v336_v16 = vsub.f32 %v334_v14, %v335_v12 }
 0x16b   : > { %v337_v17 = vand.u32 2147483647, %v336_v16 }
 0x16d   : > { %v339_v18 = vsel %vm338_vm2, %v337_v17, 0.0 }
 0x16e   : > { %340 = vadd.xlane.f32.xlu0 %v339_v18 }
 0x1fb   : > { %v341_v23 = vpop.xlane.xlu0 %340 }
 0x1fc   : > { %v342_v24 = vrot.slane %v341_v23, 4 }
 0x1fe   : > { %v343_v25 = vadd.f32 %v342_v24, %v341_v23 }
 0x200   : > { %v344_v27 = vrot.slane %v343_v25, 2 }
 0x202   : > { %v345_v28 = vadd.f32 %v344_v27, %v343_v25 }
 0x204   : > { %v346_v30 = vrot.slane %v345_v28, 1 }
 0x206   : > { %v347_v31 = vadd.f32 %v346_v30, %v345_v28 }
 0x208   : > { %465 = vpush %v347_v31 }
 0x209   : > { %467 = vpush %v357_v32 }
 0x239   : > { %s466_s30 = spop %465 }
 0x23a   : > { %v360_v33 = vstv %s466_s30  ;;  %s468_s8 = spop %467 }
 0x23b   : > { %v361_v34 = vstv %s468_s8 }
 0x23c   : > { %v362_v35 = vsel %vm359_vm3, %v360_v33, %v361_v34 }
 0x23d   : > { %364 = vst.msk [vmem:[%s244_s7] sm:$0x1] %vm363_vm4, %v362_v35 }
 0x23e PF: > { %s14_s15 = sadd.s32 1, %s487_s15  }
 0x23f   : > { %p11_p4 = scmp.ge.s32.totalorder %s14_s15, 4  }
 0x241   :  { %13 = sbr.rel (!%p11_p4) target bundleno = 1 (0x1), region = 75 }

</bundles_post_ra>
